<compile_context>
chip_gen: v7x
topology: tpu7x:2x2x1
jax: 0.10.0
libtpu: 0.0.40
codegen_flags: <defaults>
</compile_context>

<pallas_src>
import functools

import jax
import jax.numpy as jnp
from jax.experimental import pallas as pl
from jax.experimental.pallas import tpu as pltpu

LANE = 128
SUBLANE = 8
# Keep A_hat resident across both layers only while it comfortably fits VMEM
# on every generation (v7x has 64 MiB physical per TensorCore).
RESIDENT_A_BYTES = 12 * 1024 * 1024
VMEM_LIMIT_BYTES = 48 * 1024 * 1024


def _round_up(x, m):
    return (x + m - 1) // m * m


def _pad2d(x, rows, cols):
    r, c = x.shape
    return jnp.pad(x, ((0, rows - r), (0, cols - c)))


# ---------------------------------------------------------------------------
# Fused two-layer kernel for small graphs: A_hat is loaded into VMEM once and
# reused for both aggregations; single grid step => no redundant X@W work and
# no per-step pipeline overhead.
# ---------------------------------------------------------------------------
def _gcn_fused_kernel(a_ref, x_ref, w1_ref, b1_ref, w2_ref, b2_ref, o_ref):
    a = a_ref[...]
    # Layer 1: feature transform (computed exactly once), aggregate, bias, relu
    xw1 = jnp.dot(x_ref[...], w1_ref[...], preferred_element_type=jnp.float32)
    h = jnp.dot(a, xw1, preferred_element_type=jnp.float32) + b1_ref[...]
    h = jnp.maximum(h, 0.0)
    # Layer 2: feature transform, aggregate, bias
    hw2 = jnp.dot(h, w2_ref[...], preferred_element_type=jnp.float32)
    out = jnp.dot(a, hw2, preferred_element_type=jnp.float32) + b2_ref[...]
    o_ref[...] = out.astype(o_ref.dtype)


def gcn_fused(a_hat, x, w1, b1, w2, b2):
    n, f_in = x.shape
    h1 = w1.shape[1]
    f_out = w2.shape[1]
    assert a_hat.shape == (n, n)
    return pl.pallas_call(
        _gcn_fused_kernel,
        out_shape=jax.ShapeDtypeStruct((n, f_out), jnp.float32),
        grid_spec=pltpu.PrefetchScalarGridSpec(
            num_scalar_prefetch=0,
            grid=(1,),
            in_specs=[
                pl.BlockSpec((n, n), lambda i: (0, 0)),       # A_hat (resident)
                pl.BlockSpec((n, f_in), lambda i: (0, 0)),    # X
                pl.BlockSpec((f_in, h1), lambda i: (0, 0)),   # W1
                pl.BlockSpec((1, h1), lambda i: (0, 0)),      # b1
                pl.BlockSpec((h1, f_out), lambda i: (0, 0)),  # W2
                pl.BlockSpec((1, f_out), lambda i: (0, 0)),   # b2
            ],
            out_specs=pl.BlockSpec((n, f_out), lambda i: (0, 0)),
        ),
        compiler_params=pltpu.CompilerParams(
            dimension_semantics=("arbitrary",),
            vmem_limit_bytes=VMEM_LIMIT_BYTES,
        ),
    )(a_hat, x, w1, b1.reshape(1, h1), w2, b2.reshape(1, f_out))


# ---------------------------------------------------------------------------
# Tiled aggregation kernel for large graphs: out = A_hat @ XW + b (+ ReLU).
# XW is hoisted (computed once outside); the kernel only streams A_hat tiles.
# Grid = (row tiles, contraction tiles), f32 VMEM accumulator.
# ---------------------------------------------------------------------------
def _agg_kernel(a_ref, xw_ref, b_ref, o_ref, acc_ref, *, relu):
    k = pl.program_id(1)

    @pl.when(k == 0)
    def _():
        acc_ref[...] = jnp.zeros_like(acc_ref)

    acc_ref[...] += jnp.dot(a_ref[...], xw_ref[...],
                            preferred_element_type=jnp.float32)

    @pl.when(k == pl.num_programs(1) - 1)
    def _():
        out = acc_ref[...] + b_ref[...]
        if relu:
            out = jnp.maximum(out, 0.0)
        o_ref[...] = out.astype(o_ref.dtype)


def gcn_aggregate(a_hat, xw, b, *, relu, tm=256, tk=256):
    n = a_hat.shape[0]
    f_out = xw.shape[1]
    tm = min(tm, n)
    tk = min(tk, n)
    assert n % tm == 0 and n % tk == 0
    kernel = functools.partial(_agg_kernel, relu=relu)
    flops = 2 * n * n * f_out
    bytes_accessed = 4 * (n * n + 2 * n * f_out)
    return pl.pallas_call(
        kernel,
        out_shape=jax.ShapeDtypeStruct((n, f_out), jnp.float32),
        grid_spec=pltpu.PrefetchScalarGridSpec(
            num_scalar_prefetch=0,
            grid=(n // tm, n // tk),
            in_specs=[
                pl.BlockSpec((tm, tk), lambda i, k: (i, k)),      # A_hat tile
                pl.BlockSpec((tk, f_out), lambda i, k: (k, 0)),   # XW strip
                pl.BlockSpec((1, f_out), lambda i, k: (0, 0)),    # bias
            ],
            out_specs=pl.BlockSpec((tm, f_out), lambda i, k: (i, 0)),
            scratch_shapes=[pltpu.VMEM((tm, f_out), jnp.float32)],
        ),
        compiler_params=pltpu.CompilerParams(
            dimension_semantics=("parallel", "arbitrary"),
            vmem_limit_bytes=VMEM_LIMIT_BYTES,
        ),
        cost_estimate=pl.CostEstimate(
            flops=flops, transcendentals=0, bytes_accessed=bytes_accessed),
    )(a_hat, xw, b.reshape(1, f_out))


# ---------------------------------------------------------------------------
# Graph preprocessing (plain JAX glue)
# ---------------------------------------------------------------------------
def build_normalized_adjacency(edge_index, num_nodes):
    """Dense A_hat = D^{-1/2} (A + I) D^{-1/2}, matching PyG gcn_norm.

    Self-loops are added only for nodes that do not already have one
    (add_remaining_self_loops semantics); duplicate edges sum, as in PyG's
    scatter-add aggregation.
    """
    src, dst = edge_index[0], edge_index[1]
    a = jnp.zeros((num_nodes, num_nodes), dtype=jnp.float32)
    a = a.at[dst, src].add(1.0)                       # edge j -> i : A[i, j] += 1
    needs_loop = (jnp.diagonal(a) == 0.0).astype(jnp.float32)
    a = a + jnp.diag(needs_loop)                      # add remaining self-loops
    deg = jnp.sum(a, axis=1)                          # target-node degree
    d_inv_sqrt = jnp.where(deg > 0, jax.lax.rsqrt(deg), 0.0)
    return d_inv_sqrt[:, None] * a * d_inv_sqrt[None, :]


def glorot(key, shape):
    fan_in, fan_out = shape
    limit = jnp.sqrt(6.0 / (fan_in + fan_out))
    return jax.random.uniform(key, shape, jnp.float32, -limit, limit)


# ---------------------------------------------------------------------------
# Full forward pass
# ---------------------------------------------------------------------------
def gcn_forward(x, edge_index, params):
    n_orig, f_in = x.shape
    hidden = params["w1"].shape[1]
    f_out = params["w2"].shape[1]
    a_hat = build_normalized_adjacency(edge_index, n_orig)

    # Lane-pad feature dims to multiples of 128 (hidden 64 -> 128) so all
    # stores/matmuls are lane-dense.  Zero padding is exact: padded XW columns
    # are 0, bias padding is 0, relu(0)=0, and padded W2 rows are 0.
    f_in_p = _round_up(f_in, LANE)
    h_p = _round_up(hidden, LANE)
    f_out_p = _round_up(f_out, LANE)
    w1 = _pad2d(params["w1"], f_in_p, h_p)
    b1 = jnp.pad(params["b1"], (0, h_p - hidden))
    w2 = _pad2d(params["w2"], h_p, f_out_p)
    b2 = jnp.pad(params["b2"], (0, f_out_p - f_out))

    if a_hat.size * 4 <= RESIDENT_A_BYTES:
        # Small graph: single fused kernel, A_hat read from HBM exactly once.
        n_p = _round_up(n_orig, SUBLANE)
        a_p = _pad2d(a_hat, n_p, n_p)
        x_p = _pad2d(x, n_p, f_in_p)
        out = gcn_fused(a_p, x_p, w1, b1, w2, b2)
    else:
        # Large graph: hoist the (tiny) feature transforms, tile the O(N^2)
        # aggregation over rows and the contraction dimension.
        tm = tk = 256
        n_p = _round_up(n_orig, max(tm, tk))
        a_p = _pad2d(a_hat, n_p, n_p)
        x_p = _pad2d(x, n_p, f_in_p)
        xw1 = jnp.dot(x_p, w1, preferred_element_type=jnp.float32)
        h = gcn_aggregate(a_p, xw1, b1, relu=True, tm=tm, tk=tk)
        hw2 = jnp.dot(h, w2, preferred_element_type=jnp.float32)
        out = gcn_aggregate(a_p, hw2, b2, relu=False, tm=tm, tk=tk)

    return out[:n_orig, :f_out]


if __name__ == "__main__":
    key = jax.random.PRNGKey(0)
    (k_x, k_e1, k_e2, k_w1, k_w2,
     k_abig, k_xwbig, k_bbig) = jax.random.split(key, 8)

    num_nodes = 64
    node_features = 16
    hidden = 64      # conv1: node_features -> 64
    out_dim = 128    # conv2: 64 -> 128
    num_edges = 256

    # Deterministic synthetic graph + features.
    x = jax.random.normal(k_x, (num_nodes, node_features), dtype=jnp.float32)
    src = jax.random.randint(k_e1, (num_edges,), 0, num_nodes, dtype=jnp.int32)
    dst = jax.random.randint(k_e2, (num_edges,), 0, num_nodes, dtype=jnp.int32)
    edge_index = jnp.stack([src, dst], axis=0)

    # Deterministic parameter init (glorot weights, zero biases — as GCNConv).
    params = {
        "w1": glorot(k_w1, (node_features, hidden)),
        "b1": jnp.zeros((hidden,), dtype=jnp.float32),
        "w2": glorot(k_w2, (hidden, out_dim)),
        "b2": jnp.zeros((out_dim,), dtype=jnp.float32),
    }

    out = jax.block_until_ready(gcn_forward(x, edge_index, params))
    assert out.shape == (num_nodes, out_dim)

    # Pure-JAX reference check of the fused small-graph path.
    a_hat = build_normalized_adjacency(edge_index, num_nodes)
    h_ref = jnp.maximum(a_hat @ (x @ params["w1"]) + params["b1"], 0.0)
    ref = a_hat @ (h_ref @ params["w2"]) + params["b2"]
    assert jnp.allclose(out, ref, atol=2e-3, rtol=2e-3), float(
        jnp.max(jnp.abs(out - ref)))

    # Exercise the large-graph tiled aggregation kernel as well (2x2 grid,
    # k-tiled with accumulator).
    n_big, f_big = 512, 128
    a_big = jax.random.uniform(k_abig, (n_big, n_big), jnp.float32)
    xw_big = jax.random.normal(k_xwbig, (n_big, f_big), jnp.float32)
    b_big = jax.random.normal(k_bbig, (f_big,), jnp.float32)
    agg = jax.block_until_ready(
        gcn_aggregate(a_big, xw_big, b_big, relu=True, tm=256, tk=256))
    agg_ref = jnp.maximum(a_big @ xw_big + b_big, 0.0)
    assert jnp.allclose(agg, agg_ref, atol=1e-2, rtol=2e-2)

    print("KERNEL_OK")
</pallas_src>

<mosaic_0001>
module attributes {stable_mosaic.version = 11 : i64} {
  func.func @_gcn_fused_kernel(%arg0: i32, %arg1: memref<64x64xf32, #tpu.memory_space<vmem>>, %arg2: memref<64x128xf32, #tpu.memory_space<vmem>>, %arg3: memref<128x128xf32, #tpu.memory_space<vmem>>, %arg4: memref<1x128xf32, #tpu.memory_space<vmem>>, %arg5: memref<128x128xf32, #tpu.memory_space<vmem>>, %arg6: memref<1x128xf32, #tpu.memory_space<vmem>>, %arg7: memref<64x128xf32, #tpu.memory_space<vmem>>) attributes {dimension_semantics = [#tpu.dimension_semantics<arbitrary>], iteration_bounds = array<i64: 1>, scalar_prefetch = 0 : i64, scratch_operands = 0 : i64, tpu.core_type = #tpu.core_type<tc>, window_params = [{pipeline_mode = #tpu.pipeline_mode<synchronous>, transform_indices = @transform_0, window_bounds = array<i64: 64, 64>}, {pipeline_mode = #tpu.pipeline_mode<synchronous>, transform_indices = @transform_1, window_bounds = array<i64: 64, 128>}, {pipeline_mode = #tpu.pipeline_mode<synchronous>, transform_indices = @transform_2, window_bounds = array<i64: 128, 128>}, {pipeline_mode = #tpu.pipeline_mode<synchronous>, transform_indices = @transform_3, window_bounds = array<i64: 1, 128>}, {pipeline_mode = #tpu.pipeline_mode<synchronous>, transform_indices = @transform_4, window_bounds = array<i64: 128, 128>}, {pipeline_mode = #tpu.pipeline_mode<synchronous>, transform_indices = @transform_5, window_bounds = array<i64: 1, 128>}, {pipeline_mode = #tpu.pipeline_mode<synchronous>, transform_indices = @transform_6, window_bounds = array<i64: 64, 128>}]} {
    %c0 = arith.constant 0 : index
    %c0_0 = arith.constant 0 : index
    %0 = vector.load %arg1[%c0, %c0_0] : memref<64x64xf32, #tpu.memory_space<vmem>>, vector<64x64xf32>
    %c0_1 = arith.constant 0 : index
    %c0_2 = arith.constant 0 : index
    %1 = vector.load %arg2[%c0_1, %c0_2] : memref<64x128xf32, #tpu.memory_space<vmem>>, vector<64x128xf32>
    %c0_3 = arith.constant 0 : index
    %c0_4 = arith.constant 0 : index
    %2 = vector.load %arg3[%c0_3, %c0_4] : memref<128x128xf32, #tpu.memory_space<vmem>>, vector<128x128xf32>
    %cst = arith.constant dense<0.000000e+00> : vector<64x128xf32>
    %3 = tpu.matmul %1, %2, %cst {dimension_numbers = #tpu.dot_dimension_numbers<[1], [0], [0], [1], [0, 0, 1, 1], [], []>} : vector<64x128xf32>, vector<128x128xf32>, vector<64x128xf32> -> vector<64x128xf32>
    %cst_5 = arith.constant dense<0.000000e+00> : vector<64x128xf32>
    %4 = tpu.matmul %0, %3, %cst_5 {dimension_numbers = #tpu.dot_dimension_numbers<[1], [0], [0], [1], [0, 0, 1, 1], [], []>} : vector<64x64xf32>, vector<64x128xf32>, vector<64x128xf32> -> vector<64x128xf32>
    %c0_6 = arith.constant 0 : index
    %c0_7 = arith.constant 0 : index
    %5 = vector.load %arg4[%c0_6, %c0_7] : memref<1x128xf32, #tpu.memory_space<vmem>>, vector<1x128xf32>
    %6 = vector.broadcast %5 : vector<1x128xf32> to vector<64x128xf32>
    %7 = arith.addf %4, %6 : vector<64x128xf32>
    %cst_8 = arith.constant 0.000000e+00 : f32
    %8 = vector.broadcast %cst_8 : f32 to vector<64x128xf32>
    %9 = arith.maximumf %7, %8 : vector<64x128xf32>
    %c0_9 = arith.constant 0 : index
    %c0_10 = arith.constant 0 : index
    %10 = vector.load %arg5[%c0_9, %c0_10] : memref<128x128xf32, #tpu.memory_space<vmem>>, vector<128x128xf32>
    %cst_11 = arith.constant dense<0.000000e+00> : vector<64x128xf32>
    %11 = tpu.matmul %9, %10, %cst_11 {dimension_numbers = #tpu.dot_dimension_numbers<[1], [0], [0], [1], [0, 0, 1, 1], [], []>} : vector<64x128xf32>, vector<128x128xf32>, vector<64x128xf32> -> vector<64x128xf32>
    %cst_12 = arith.constant dense<0.000000e+00> : vector<64x128xf32>
    %12 = tpu.matmul %0, %11, %cst_12 {dimension_numbers = #tpu.dot_dimension_numbers<[1], [0], [0], [1], [0, 0, 1, 1], [], []>} : vector<64x64xf32>, vector<64x128xf32>, vector<64x128xf32> -> vector<64x128xf32>
    %c0_13 = arith.constant 0 : index
    %c0_14 = arith.constant 0 : index
    %13 = vector.load %arg6[%c0_13, %c0_14] : memref<1x128xf32, #tpu.memory_space<vmem>>, vector<1x128xf32>
    %14 = vector.broadcast %13 : vector<1x128xf32> to vector<64x128xf32>
    %15 = arith.addf %12, %14 : vector<64x128xf32>
    %c0_15 = arith.constant 0 : index
    %c0_16 = arith.constant 0 : index
    %16 = vector.load %arg7[%c0_15, %c0_16] : memref<64x128xf32, #tpu.memory_space<vmem>>, vector<64x128xf32>
    tpu.vector_store %arg7[%c0_15, %c0_16], %15 {strides = array<i32>} : memref<64x128xf32, #tpu.memory_space<vmem>>, vector<64x128xf32>,
    return
  }
  func.func @transform_0(%arg0: i32) -> (i32, i32) {
    %c0_i32 = arith.constant 0 : i32
    %c0_i32_0 = arith.constant 0 : i32
    %c0_i32_1 = arith.constant 0 : i32
    return %c0_i32, %c0_i32_0 : i32, i32
  }
  func.func @transform_1(%arg0: i32) -> (i32, i32) {
    %c0_i32 = arith.constant 0 : i32
    %c0_i32_0 = arith.constant 0 : i32
    %c0_i32_1 = arith.constant 0 : i32
    return %c0_i32, %c0_i32_0 : i32, i32
  }
  func.func @transform_2(%arg0: i32) -> (i32, i32) {
    %c0_i32 = arith.constant 0 : i32
    %c0_i32_0 = arith.constant 0 : i32
    %c0_i32_1 = arith.constant 0 : i32
    return %c0_i32, %c0_i32_0 : i32, i32
  }
  func.func @transform_3(%arg0: i32) -> (i32, i32) {
    %c0_i32 = arith.constant 0 : i32
    %c0_i32_0 = arith.constant 0 : i32
    %c0_i32_1 = arith.constant 0 : i32
    return %c0_i32, %c0_i32_0 : i32, i32
  }
  func.func @transform_4(%arg0: i32) -> (i32, i32) {
    %c0_i32 = arith.constant 0 : i32
    %c0_i32_0 = arith.constant 0 : i32
    %c0_i32_1 = arith.constant 0 : i32
    return %c0_i32, %c0_i32_0 : i32, i32
  }
  func.func @transform_5(%arg0: i32) -> (i32, i32) {
    %c0_i32 = arith.constant 0 : i32
    %c0_i32_0 = arith.constant 0 : i32
    %c0_i32_1 = arith.constant 0 : i32
    return %c0_i32, %c0_i32_0 : i32, i32
  }
  func.func @transform_6(%arg0: i32) -> (i32, i32) {
    %c0_i32 = arith.constant 0 : i32
    %c0_i32_0 = arith.constant 0 : i32
    %c0_i32_1 = arith.constant 0 : i32
    return %c0_i32, %c0_i32_0 : i32, i32
  }
}

</mosaic_0001>

<bundles_post_ra>
// kernel: tpu_custom_call.1
= control target key start
LH: loop header
LB: loop body
LE: loop exit
PB: predicated region body
PF: predicated region fallthrough
CT: control target
= control target key end

     0   :  { %11 = vsyncpa [#allocation3], 0  ;;  %s1265_s0 = inlined_call_operand.hbm [shape: f32[64,64], index: 0, kind: input, shape index: {}]   ;;  %s1266_s1 = inlined_call_operand.hbm [shape: f32[64,128], index: 1, kind: input, shape index: {}]   ;;  %s1267_s2 = inlined_call_operand.hbm [shape: f32[128,128], index: 2, kind: input, shape index: {}]   ;;  %s1268_s3 = inlined_call_operand.vmem [shape: f32[1,128], index: 3, kind: input, shape index: {}]   ;;  %s1269_s4 = inlined_call_operand.hbm [shape: f32[128,128], index: 4, kind: input, shape index: {}]   ;;  %s1270_s5 = inlined_call_operand.vmem [shape: f32[1,128], index: 5, kind: input, shape index: {}]   ;;  %s1271_s6 = inlined_call_operand.hbm [shape: f32[64,128], index: 6, kind: output, shape index: {}]  }
   0x1   :  { %12 = vsyncpa [#allocation6], 0 }
   0x2   :  { %13 = vsyncpa [#allocation9], 0 }
   0x3   :  { %14 = vsyncpa [#allocation4], 0  ;;  %s1084_s21 = smov [#allocation5]   ;;  %s1085_s23 = smov [#allocation2]  }
   0x4   :  { %s32_s22 = sshll.u32 %s1084_s21, 4  ;;  %s20_s24 = sshll.u32 %s1085_s23, 4  ;;  %s33_s22 = int_to_ptr.vmem [resolvable:$true] %s32_s22  ;;  %s1126_s24 = int_to_ptr.vmem [resolvable:$true] %s20_s24 }
   0x5   :  { %s966_s27 = scalar_lea.hbm %s1266_s1, 1024 }
   0x6   :  { %p967_p0 = scmp.ne.s32.totalorder %s1266_s1, %s966_s27  ;;  %p970_p1 = scmp.lt.u32.totalorder %s966_s27, %s1266_s1 }
   0x8   :  { %p972_p2 = pnand %p970_p1, %p967_p0 }
   0xa   :  { %975 = shalt.err (!%p972_p2)
}
   0xb   :  { %s976_s8 = scalar_lea.vmem %s33_s22, 1024  ;;  %p981_p4 = scmp.lt.s32.totalorder %s33_s22, %s33_s22 }
   0xc   :  { %p977_p3 = scmp.ne.s32.totalorder %s33_s22, %s976_s8  ;;  %p982_p5 = scmp.lt.s32.totalorder %s976_s8, %s976_s8 }
   0xe   :  { %p983_p6 = por %p982_p5, %p981_p4 }
  0x10   :  { %p984_p7 = pnand %p983_p6, %p977_p3 }
  0x12   :  { %987 = shalt.err (!%p984_p7)
}
  0x13   :  { %s1086_s9 = smov 128   ;;  %s1087_s10 = smov 8  }
  0x14   :  { %38 = dma.hbm_to_vmem [thread:$0]  %s1266_s1, 1024, %s33_s22, [#allocation6], %s1086_s9, %s1086_s9, %s1087_s10  }
  0x15   :  { %s988_s15 = scalar_lea.hbm %s1265_s0, 1024 }
  0x16   :  { %p989_p8 = scmp.ne.s32.totalorder %s1265_s0, %s988_s15  ;;  %p992_p9 = scmp.lt.u32.totalorder %s988_s15, %s1265_s0 }
  0x18   :  { %p994_p10 = pnand %p992_p9, %p989_p8 }
  0x1a   :  { %997 = shalt.err (!%p994_p10)
}
  0x1b   :  { %s998_s20 = scalar_lea.vmem %s1126_s24, 1024  ;;  %p1003_p12 = scmp.lt.s32.totalorder %s1126_s24, %s1126_s24 }
  0x1c   :  { %p999_p11 = scmp.ne.s32.totalorder %s1126_s24, %s998_s20  ;;  %p1004_p13 = scmp.lt.s32.totalorder %s998_s20, %s998_s20 }
  0x1e   :  { %p1005_p0 = por %p1004_p13, %p1003_p12 }
  0x20   :  { %p1006_p1 = pnand %p1005_p0, %p999_p11 }
  0x22   :  { %1009 = shalt.err (!%p1006_p1)
}
  0x23   :  { %26 = dma.hbm_to_vmem [thread:$0]  %s1265_s0, 1024, %s1126_s24, [#allocation3], %s1086_s9, %s1086_s9, %s1087_s10  }
  0x24   :  { %s1088_s22 = smov [#allocation7]   ;;  %s1089_s25 = smov [#allocation8]  }
  0x25   :  { %s44_s23 = sshll.u32 %s1088_s22, 4  ;;  %s58_s26 = sshll.u32 %s1089_s25, 4  ;;  %s45_s23 = int_to_ptr.vmem [resolvable:$true] %s44_s23  ;;  %s1163_s26 = int_to_ptr.vmem [resolvable:$true] %s58_s26 }
  0x26   :  { %s1010_s29 = scalar_lea.hbm %s1267_s2, 2048 }
  0x27   :  { %p1011_p2 = scmp.ne.s32.totalorder %s1267_s2, %s1010_s29  ;;  %p1014_p3 = scmp.lt.u32.totalorder %s1010_s29, %s1267_s2 }
  0x29   :  { %p1016_p4 = pnand %p1014_p3, %p1011_p2 }
  0x2b   :  { %1019 = shalt.err (!%p1016_p4)
}
  0x2c   :  { %s1020_s0 = scalar_lea.vmem %s45_s23, 2048  ;;  %p1025_p6 = scmp.lt.s32.totalorder %s45_s23, %s45_s23 }
  0x2d   :  { %p1021_p5 = scmp.ne.s32.totalorder %s45_s23, %s1020_s0  ;;  %p1026_p7 = scmp.lt.s32.totalorder %s1020_s0, %s1020_s0 }
  0x2f   :  { %p1027_p8 = por %p1026_p7, %p1025_p6 }
  0x31   :  { %p1028_p9 = pnand %p1027_p8, %p1021_p5 }
  0x33   :  { %1031 = shalt.err (!%p1028_p9)
}
  0x34   :  { %50 = dma.hbm_to_vmem [thread:$0]  %s1267_s2, 2048, %s45_s23, [#allocation6], %s1086_s9, %s1086_s9, %s1087_s10  }
  0x35   :  { %s1032_s15 = scalar_lea.hbm %s1269_s4, 2048 }
  0x36   :  { %p1033_p10 = scmp.ne.s32.totalorder %s1269_s4, %s1032_s15  ;;  %p1036_p11 = scmp.lt.u32.totalorder %s1032_s15, %s1269_s4 }
  0x38   :  { %p1038_p12 = pnand %p1036_p11, %p1033_p10 }
  0x3a   :  { %1041 = shalt.err (!%p1038_p12)
}
  0x3b   :  { %s1042_s20 = scalar_lea.vmem %s1163_s26, 2048  ;;  %p1047_p0 = scmp.lt.s32.totalorder %s1163_s26, %s1163_s26 }
  0x3c   :  { %p1043_p13 = scmp.ne.s32.totalorder %s1163_s26, %s1042_s20  ;;  %p1048_p1 = scmp.lt.s32.totalorder %s1042_s20, %s1042_s20 }
  0x3e   :  { %p1049_p2 = por %p1048_p1, %p1047_p0 }
  0x40   :  { %p1050_p3 = pnand %p1049_p2, %p1043_p13 }
  0x42   :  { %1053 = shalt.err (!%p1050_p3)
}
  0x43   :  { %64 = dma.hbm_to_vmem [thread:$0]  %s1269_s4, 2048, %s1163_s26, [#allocation9], %s1086_s9, %s1086_s9, %s1087_s10  }
  0x44   :  { %1076 = dma.done.wait [#allocation3], 1024  }
  0x45   :  { %1077 = vsyncadd [#allocation3], 4294966272 }
  0x46   :  { %1078 = dma.done.wait [#allocation6], 3072  }
  0x47   :  { %1079 = vsyncadd [#allocation6], 4294964224 }
  0x48   :  { %1080 = dma.done.wait [#allocation9], 2048  }
  0x49   :  { %1081 = vsyncadd [#allocation9], 4294965248  ;;  %v95_v0 = vld [vmem:[#allocation7] sm:$0xff]  ;;  %v96_v1 = vld [vmem:[#allocation7 + $0x8] sm:$0xff]  ;;  %vm223_vm0 = vcmask 523264   ;;  %s1090_s23 = smov [#allocation10]  }
  0x4a   :  { %v97_v2 = vld [vmem:[#allocation7 + $0x10] sm:$0xff]  ;;  %v863_v3 = vpack.c.bf16 %v96_v1, %v95_v0  ;;  %v98_v4 = vld [vmem:[#allocation7 + $0x18] sm:$0xff]  ;;  %v99_v6 = vld [vmem:[#allocation7 + $0x20] sm:$0xff]  ;;  %s607_s25 = sshll.u32 %s1090_s23, 4  ;;  %s608_s25 = int_to_ptr.vmem [resolvable:$true] %s607_s25 }
  0x4b   :  { %v867_v5 = vpack.c.bf16 %v98_v4, %v97_v2  ;;  %v100_v7 = vld [vmem:[#allocation7 + $0x28] sm:$0xff]  ;;  %v87_v9 = vld [vmem:[#allocation5] sm:$0xff]  ;;  %v101_v10 = vld [vmem:[#allocation7 + $0x30] sm:$0xff]  ;;  %p1059_p5 = scmp.lt.s32.totalorder %s608_s25, %s608_s25 }
  0x4c   :  { %864 = vmatprep.subr.bf16.mxu0 %v863_v3  ;;  %v871_v8 = vpack.c.bf16 %v100_v7, %v99_v6  ;;  %v102_v11 = vld [vmem:[#allocation7 + $0x38] sm:$0xff]  ;;  %751 = vmatprep.mubr.f32.mxu0 %v87_v9  ;;  %v103_v13 = vld [vmem:[#allocation7 + $0x40] sm:$0xff]  ;;  %v104_v14 = vld [vmem:[#allocation7 + $0x48] sm:$0xff] }
  0x4d   :  { %866 = vmatpush3.bf16.msra.mxu0 %v863_v3  ;;  %v875_v12 = vpack.c.bf16 %v102_v11, %v101_v10  ;;  %v879_v15 = vpack.c.bf16 %v104_v14, %v103_v13  ;;  %v105_v16 = vld [vmem:[#allocation7 + $0x50] sm:$0xff]  ;;  %v106_v17 = vld [vmem:[#allocation7 + $0x58] sm:$0xff]  ;;  %v107_v19 = vld [vmem:[#allocation7 + $0x60] sm:$0xff] }
  0x4e   :  { %868 = vmatprep.subr.bf16.mxu0 %v867_v5  ;;  %v883_v18 = vpack.c.bf16 %v106_v17, %v105_v16  ;;  %v108_v20 = vld [vmem:[#allocation7 + $0x68] sm:$0xff]  ;;  %v109_v22 = vld [vmem:[#allocation7 + $0x70] sm:$0xff]  ;;  %v110_v23 = vld [vmem:[#allocation7 + $0x78] sm:$0xff] }
  0x4f   :  { %v887_v21 = vpack.c.bf16 %v108_v20, %v107_v19  ;;  %v891_v24 = vpack.c.bf16 %v110_v23, %v109_v22  ;;  %v88_v25 = vld [vmem:[#allocation5 + $0x8] sm:$0xff]  ;;  %v89_v26 = vld [vmem:[#allocation5 + $0x10] sm:$0xff]  ;;  %v90_v27 = vld [vmem:[#allocation5 + $0x18] sm:$0xff] }
  0x50   :  { %v91_v28 = vld [vmem:[#allocation5 + $0x20] sm:$0xff]  ;;  %v92_v29 = vld [vmem:[#allocation5 + $0x28] sm:$0xff]  ;;  %v93_v30 = vld [vmem:[#allocation5 + $0x30] sm:$0xff] }
  0x51   :  { %870 = vmatpush3.bf16.msra.mxu0 %v867_v5  ;;  %v94_v31 = vld [vmem:[#allocation5 + $0x38] sm:$0xff]  ;;  %v79_v32 = vld [vmem:[#allocation2] sm:$0xff]  ;;  %v362_v43 = vld [vmem:[#allocation8 + $0x8] sm:$0xff] }
  0x52   :  { %872 = vmatprep.subr.bf16.mxu0 %v871_v8  ;;  %779 = vmatprep.mubr.msk.f32.mxu1 %vm223_vm0, %v79_v32  ;;  %v361_v42 = vld [vmem:[#allocation8] sm:$0xff]  ;;  %v363_v48 = vld [vmem:[#allocation8 + $0x10] sm:$0xff]  ;;  %v364_v49 = vld [vmem:[#allocation8 + $0x18] sm:$0xff] }
  0x53   :  { %v911_v47 = vpack.c.bf16 %v362_v43, %v361_v42  ;;  %v1202_v50 = vld [vmem:[#allocation2 + $0x8] sm:$0xff]  ;;  %v1204_v51 = vld [vmem:[#allocation2 + $0x10] sm:$0xff]  ;;  %v915_v52 = vpack.c.bf16 %v364_v49, %v363_v48  ;;  %v365_v53 = vld [vmem:[#allocation8 + $0x20] sm:$0xff] }
  0x54   :  { %v366_v54 = vld [vmem:[#allocation8 + $0x28] sm:$0xff]  ;;  %v1210_v55 = vld [vmem:[#allocation2 + $0x18] sm:$0xff]  ;;  %v1212_v56 = vld [vmem:[#allocation2 + $0x20] sm:$0xff] }
  0x55   :  { %874 = vmatpush3.bf16.msra.mxu0 %v871_v8  ;;  %v919_v57 = vpack.c.bf16 %v366_v54, %v365_v53  ;;  %v367_v58 = vld [vmem:[#allocation8 + $0x30] sm:$0xff]  ;;  %v368_v59 = vld [vmem:[#allocation8 + $0x38] sm:$0xff]  ;;  %v1218_v60 = vld [vmem:[#allocation2 + $0x28] sm:$0xff] }
  0x56   :  { %876 = vmatprep.subr.bf16.mxu0 %v875_v12  ;;  %v1220_v61 = vld [vmem:[#allocation2 + $0x30] sm:$0xff]  ;;  %v923_v62 = vpack.c.bf16 %v368_v59, %v367_v58  ;;  %v369_v63 = vld [vmem:[#allocation8 + $0x40] sm:$0xff]  ;;  %v370_v0 = vld [vmem:[#allocation8 + $0x48] sm:$0xff] }
  0x57   :  { %v1226_v1 = vld [vmem:[#allocation2 + $0x38] sm:$0xff]  ;;  %v927_v2 = vpack.c.bf16 %v370_v0, %v369_v63  ;;  %v371_v3 = vld [vmem:[#allocation8 + $0x50] sm:$0xff]  ;;  %v373_v6 = vld [vmem:[#allocation8 + $0x60] sm:$0xff] }
  0x58   :  { %v372_v4 = vld [vmem:[#allocation8 + $0x58] sm:$0xff]  ;;  %v374_v7 = vld [vmem:[#allocation8 + $0x68] sm:$0xff]  ;;  %v375_v9 = vld [vmem:[#allocation8 + $0x70] sm:$0xff] }
  0x59   :  { %878 = vmatpush3.bf16.msra.mxu0 %v875_v12  ;;  %v931_v5 = vpack.c.bf16 %v372_v4, %v371_v3  ;;  %v935_v8 = vpack.c.bf16 %v374_v7, %v373_v6  ;;  %v376_v10 = vld [vmem:[#allocation8 + $0x78] sm:$0xff]  ;;  %v621_v12 = vld [vmem:[%s1268_s3] ss:$0 sm:$0xff] }
  0x5a   :  { %880 = vmatprep.subr.bf16.mxu0 %v879_v15  ;;  %v939_v11 = vpack.c.bf16 %v376_v10, %v375_v9  ;;  %v630_v49 = vld [vmem:[%s1270_s5] ss:$0 sm:$0xff]  ;;  %s1054_s5 = scalar_lea.vmem %s608_s25, 1024 }
  0x5b   :  { %p1055_p4 = scmp.ne.s32.totalorder %s608_s25, %s1054_s5  ;;  %p1060_p6 = scmp.lt.s32.totalorder %s1054_s5, %s1054_s5 }
  0x5d   :  { %882 = vmatpush3.bf16.msra.mxu0 %v879_v15  ;;  %p1061_p7 = por %p1060_p6, %p1059_p5 }
  0x5e   :  { %884 = vmatprep.subr.bf16.mxu0 %v883_v18 }
  0x5f   :  { %p1062_p8 = pnand %p1061_p7, %p1055_p4 }
  0x61   :  { %886 = vmatpush3.bf16.msra.mxu0 %v883_v18 }
  0x62   :  { %888 = vmatprep.subr.bf16.mxu0 %v887_v21 }
  0x65   :  { %890 = vmatpush3.bf16.msra.mxu0 %v887_v21 }
  0x66   :  { %892 = vmatprep.subr.bf16.mxu0 %v891_v24 }
  0x69   :  { %894 = vmatpush3.bf16.msra.mxu0 %v891_v24 }
  0x6c   :  { %752 = vmatmul.mubr.f32.vlgmr.msra.gmra.mrb[0].mxu0 %v88_v25 }
  0x6d   :  { %754 = vmatprep.mubr.f32.mxu0 %v89_v26 }
  0x70   :  { %755 = vmatmul.mubr.f32.gmra.mrb[2].mxu0 %v90_v27 }
  0x71   :  { %757 = vmatprep.mubr.f32.mxu0 %v91_v28 }
  0x74   :  { %758 = vmatmul.mubr.f32.gmra.mrb[4].mxu0 %v92_v29 }
  0x75   :  { %760 = vmatprep.mubr.f32.mxu0 %v93_v30 }
  0x78   :  { %761 = vmatmul.mubr.f32.gmra.mrb[6].mxu0 %v94_v31 }
  0x79   :  { %851 = vmatprep.mubr.msk.f32.mxu0 %vm223_vm0, %v79_v32 }
 0x13f   :  { %v753_v33 = vpop.f32.mrb[0].mxu0 }
 0x140   :  { %v177_v34 = vpop.f32.mrb[1].mxu0 }
 0x141   :  { %v895_v35 = vpack.c.bf16 %v753_v33, %v177_v34 }
 0x143   :  { %v756_v36 = vpop.f32.mrb[2].mxu0  ;;  %896 = vmatprep.subr.bf16.mxu1 %v895_v35 }
 0x144   :  { %v187_v37 = vpop.f32.mrb[3].mxu0  ;;  %898 = vmatpush3.bf16.msra.mxu1 %v895_v35 }
 0x145   :  { %v899_v38 = vpack.c.bf16 %v756_v36, %v187_v37 }
 0x147   :  { %v759_v39 = vpop.f32.mrb[4].mxu0  ;;  %900 = vmatprep.subr.bf16.mxu1 %v899_v38 }
 0x148   :  { %v197_v40 = vpop.f32.mrb[5].mxu0  ;;  %902 = vmatpush3.bf16.msra.mxu1 %v899_v38 }
 0x149   :  { %v903_v41 = vpack.c.bf16 %v759_v39, %v197_v40 }
 0x14b   :  { %v762_v44 = vpop.f32.mrb[6].mxu0  ;;  %904 = vmatprep.subr.bf16.mxu1 %v903_v41 }
 0x14c   :  { %v207_v45 = vpop.f32.mrb[7].mxu0  ;;  %906 = vmatpush3.bf16.msra.mxu1 %v903_v41 }
 0x14d   :  { %v907_v46 = vpack.c.bf16 %v762_v44, %v207_v45 }
 0x14f   :  { %908 = vmatprep.subr.bf16.mxu1 %v907_v46 }
 0x150   :  { %910 = vmatpush3.bf16.msra.mxu1 %v907_v46 }
 0x151   :  { %912 = vmatprep.subr.bf16.mxu1 %v911_v47 }
 0x153   :  { %780 = vmatmul.mubr.msk.f32.vlgmr.msra.gmra.mrb[0].mxu1 %vm223_vm0, %v1202_v50 }
 0x154   :  { %782 = vmatprep.mubr.msk.f32.mxu1 %vm223_vm0, %v1204_v51  ;;  %914 = vmatpush3.bf16.msra.mxu1 %v911_v47 }
 0x155   :  { %916 = vmatprep.subr.bf16.mxu1 %v915_v52 }
 0x157   :  { %783 = vmatmul.mubr.msk.f32.gmra.mrb[2].mxu1 %vm223_vm0, %v1210_v55 }
 0x158   :  { %785 = vmatprep.mubr.msk.f32.mxu1 %vm223_vm0, %v1212_v56  ;;  %918 = vmatpush3.bf16.msra.mxu1 %v915_v52 }
 0x159   :  { %920 = vmatprep.subr.bf16.mxu1 %v919_v57 }
 0x15b   :  { %786 = vmatmul.mubr.msk.f32.gmra.mrb[4].mxu1 %vm223_vm0, %v1218_v60 }
 0x15c   :  { %788 = vmatprep.mubr.msk.f32.mxu1 %vm223_vm0, %v1220_v61  ;;  %922 = vmatpush3.bf16.msra.mxu1 %v919_v57 }
 0x15d   :  { %924 = vmatprep.subr.bf16.mxu1 %v923_v62 }
 0x15f   :  { %789 = vmatmul.mubr.msk.f32.gmra.mrb[6].mxu1 %vm223_vm0, %v1226_v1 }
 0x160   :  { %926 = vmatpush3.bf16.msra.mxu1 %v923_v62 }
 0x161   :  { %928 = vmatprep.subr.bf16.mxu1 %v927_v2 }
 0x164   :  { %930 = vmatpush3.bf16.msra.mxu1 %v927_v2 }
 0x165   :  { %932 = vmatprep.subr.bf16.mxu1 %v931_v5 }
 0x168   :  { %934 = vmatpush3.bf16.msra.mxu1 %v931_v5 }
 0x169   :  { %936 = vmatprep.subr.bf16.mxu1 %v935_v8 }
 0x16c   :  { %938 = vmatpush3.bf16.msra.mxu1 %v935_v8 }
 0x16d   :  { %940 = vmatprep.subr.bf16.mxu1 %v939_v11 }
 0x170   :  { %942 = vmatpush3.bf16.msra.mxu1 %v939_v11 }
 0x226   :  { %v781_v13 = vpop.f32.mrb[0].mxu1 }
 0x227   :  { %v320_v14 = vadd.f32 %v781_v13, %v621_v12  ;;  %v314_v15 = vpop.f32.mrb[1].mxu1 }
 0x228   :  { %v315_v16 = vadd.f32 %v621_v12, %v314_v15 }
 0x229   :  { %v354_v19 = vmax.f32 %v320_v14, 0.0 }
 0x22a   :  { %v353_v17 = vmax.f32 %v315_v16, 0.0  ;;  %v784_v18 = vpop.f32.mrb[2].mxu1 }
 0x22b   :  { %v330_v20 = vadd.f32 %v784_v18, %v621_v12  ;;  %v324_v21 = vpop.f32.mrb[3].mxu1 }
 0x22c   :  { %v325_v22 = vadd.f32 %v621_v12, %v324_v21  ;;  %823 = vmatprep.mubr.f32.mxu1 %v353_v17 }
 0x22d   :  { %824 = vmatmul.mubr.f32.vlgmr.msra.gmra.mrb[8].mxu1 %v354_v19  ;;  %v356_v25 = vmax.f32 %v330_v20, 0.0 }
 0x22e   :  { %v355_v23 = vmax.f32 %v325_v22, 0.0  ;;  %v787_v24 = vpop.f32.mrb[4].mxu1 }
 0x22f   :  { %v340_v26 = vadd.f32 %v787_v24, %v621_v12  ;;  %v334_v27 = vpop.f32.mrb[5].mxu1 }
 0x230   :  { %v335_v28 = vadd.f32 %v621_v12, %v334_v27  ;;  %826 = vmatprep.mubr.f32.mxu1 %v355_v23 }
 0x231   :  { %827 = vmatmul.mubr.f32.gmra.mrb[10].mxu1 %v356_v25  ;;  %v358_v31 = vmax.f32 %v340_v26, 0.0 }
 0x232   :  { %v357_v29 = vmax.f32 %v335_v28, 0.0  ;;  %v790_v30 = vpop.f32.mrb[6].mxu1 }
 0x233   :  { %v350_v32 = vadd.f32 %v790_v30, %v621_v12  ;;  %v344_v33 = vpop.f32.mrb[7].mxu1 }
 0x234   :  { %v345_v34 = vadd.f32 %v621_v12, %v344_v33  ;;  %829 = vmatprep.mubr.f32.mxu1 %v357_v29 }
 0x235   :  { %830 = vmatmul.mubr.f32.gmra.mrb[12].mxu1 %v358_v31  ;;  %v360_v36 = vmax.f32 %v350_v32, 0.0 }
 0x236   :  { %v359_v35 = vmax.f32 %v345_v34, 0.0 }
 0x238   :  { %832 = vmatprep.mubr.f32.mxu1 %v359_v35 }
 0x239   :  { %833 = vmatmul.mubr.f32.gmra.mrb[14].mxu1 %v360_v36 }
 0x300   :  { %v825_v37 = vpop.f32.mrb[8].mxu1 }
 0x301   :  { %v443_v38 = vpop.f32.mrb[9].mxu1 }
 0x302   :  { %v943_v39 = vpack.c.bf16 %v825_v37, %v443_v38 }
 0x304   :  { %v828_v40 = vpop.f32.mrb[10].mxu1  ;;  %944 = vmatprep.subr.bf16.mxu0 %v943_v39 }
 0x305   :  { %v453_v41 = vpop.f32.mrb[11].mxu1  ;;  %946 = vmatpush3.bf16.msra.mxu0 %v943_v39 }
 0x306   :  { %v947_v42 = vpack.c.bf16 %v828_v40, %v453_v41 }
 0x308   :  { %v831_v43 = vpop.f32.mrb[12].mxu1  ;;  %948 = vmatprep.subr.bf16.mxu0 %v947_v42 }
 0x309   :  { %v463_v44 = vpop.f32.mrb[13].mxu1  ;;  %950 = vmatpush3.bf16.msra.mxu0 %v947_v42 }
 0x30a   :  { %v951_v45 = vpack.c.bf16 %v831_v43, %v463_v44 }
 0x30c   :  { %v834_v46 = vpop.f32.mrb[14].mxu1  ;;  %952 = vmatprep.subr.bf16.mxu0 %v951_v45 }
 0x30d   :  { %v473_v47 = vpop.f32.mrb[15].mxu1  ;;  %954 = vmatpush3.bf16.msra.mxu0 %v951_v45 }
 0x30e   :  { %v955_v48 = vpack.c.bf16 %v834_v46, %v473_v47 }
 0x310   :  { %956 = vmatprep.subr.bf16.mxu0 %v955_v48 }
 0x311   :  { %958 = vmatpush3.bf16.msra.mxu0 %v955_v48 }
 0x314   :  { %852 = vmatmul.mubr.msk.f32.vlgmr.msra.gmra.mrb[8].mxu0 %vm223_vm0, %v1202_v50 }
 0x315   :  { %854 = vmatprep.mubr.msk.f32.mxu0 %vm223_vm0, %v1204_v51 }
 0x318   :  { %855 = vmatmul.mubr.msk.f32.gmra.mrb[10].mxu0 %vm223_vm0, %v1210_v55 }
 0x319   :  { %857 = vmatprep.mubr.msk.f32.mxu0 %vm223_vm0, %v1212_v56 }
 0x31c   :  { %858 = vmatmul.mubr.msk.f32.gmra.mrb[12].mxu0 %vm223_vm0, %v1218_v60 }
 0x31d   :  { %860 = vmatprep.mubr.msk.f32.mxu0 %vm223_vm0, %v1220_v61 }
 0x320   :  { %861 = vmatmul.mubr.msk.f32.gmra.mrb[14].mxu0 %vm223_vm0, %v1226_v1 }
 0x3e7   :  { %v853_v50 = vpop.f32.mrb[8].mxu0 }
 0x3e8   :  { %v561_v51 = vadd.f32 %v853_v50, %v630_v49  ;;  %v555_v52 = vpop.f32.mrb[9].mxu0 }
 0x3e9   :  { %v556_v53 = vadd.f32 %v630_v49, %v555_v52 }
 0x3ea   :  { %595 = vst [vmem:[#allocation10 + $0x8] sm:$0xff] %v561_v51 }
 0x3eb   :  { %594 = vst [vmem:[#allocation10] sm:$0xff] %v556_v53  ;;  %v856_v54 = vpop.f32.mrb[10].mxu0 }
 0x3ec   :  { %v571_v55 = vadd.f32 %v856_v54, %v630_v49  ;;  %v565_v56 = vpop.f32.mrb[11].mxu0 }
 0x3ed   :  { %v566_v57 = vadd.f32 %v630_v49, %v565_v56 }
 0x3ee   :  { %597 = vst [vmem:[#allocation10 + $0x18] sm:$0xff] %v571_v55 }
 0x3ef   :  { %596 = vst [vmem:[#allocation10 + $0x10] sm:$0xff] %v566_v57  ;;  %v859_v58 = vpop.f32.mrb[12].mxu0 }
 0x3f0   :  { %v581_v59 = vadd.f32 %v859_v58, %v630_v49  ;;  %v575_v60 = vpop.f32.mrb[13].mxu0 }
 0x3f1   :  { %v576_v61 = vadd.f32 %v630_v49, %v575_v60 }
 0x3f2   :  { %599 = vst [vmem:[#allocation10 + $0x28] sm:$0xff] %v581_v59 }
 0x3f3   :  { %598 = vst [vmem:[#allocation10 + $0x20] sm:$0xff] %v576_v61  ;;  %v862_v62 = vpop.f32.mrb[14].mxu0 }
 0x3f4   :  { %v591_v63 = vadd.f32 %v862_v62, %v630_v49  ;;  %v585_v0 = vpop.f32.mrb[15].mxu0 }
 0x3f5   :  { %v586_v1 = vadd.f32 %v630_v49, %v585_v0 }
 0x3f6   :  { %601 = vst [vmem:[#allocation10 + $0x38] sm:$0xff] %v591_v63 }
 0x3f7   :  { %600 = vst [vmem:[#allocation10 + $0x30] sm:$0xff] %v586_v1 }
 0x3f8   :  { %1065 = shalt.err (!%p1062_p8)
}
 0x3f9   :  { %s1066_s28 = scalar_lea.hbm %s1271_s6, 1024 }
 0x3fa   :  { %p1067_p9 = scmp.ne.s32.totalorder %s1271_s6, %s1066_s28  ;;  %p1070_p10 = scmp.lt.u32.totalorder %s1066_s28, %s1271_s6 }
 0x3fc   :  { %p1072_p11 = pnand %p1070_p10, %p1067_p9 }
 0x3fe   :  { %1075 = shalt.err (!%p1072_p11)
}
 0x3ff   :  { %613 = dma.vmem_to_hbm [thread:$0]  %s608_s25, 1024, %s1271_s6, [#allocation4], %s1086_s9, %s1086_s9, %s1087_s10  }
 0x400   :  { %1082 = dma.done.wait [#allocation4], 1024  }
 0x401   :  { %1083 = vsyncadd [#allocation4], 4294966272 }
 0x402   :  { %617 = vsyncpa [#allocation3], 1 }
 0x403   :  { %618 = vsyncpa [#allocation6], 1 }
 0x404   :  { %619 = vsyncpa [#allocation9], 1 }
 0x405   :  { %620 = vsyncpa [#allocation4], 1 }

</bundles_post_ra>
